<compile_context>
chip_gen: v6e
topology: v6e:2x2x1
jax: 0.10.0
libtpu: 0.0.40
codegen_flags: <defaults>
</compile_context>

<pallas_src>
import functools

import jax
import jax.numpy as jnp
from jax.experimental import pallas as pl
from jax.experimental.pallas import tpu as pltpu

LN_EPS = 1e-5  # PyTorch nn.LayerNorm default


def _round_up(x, m):
    return (x + m - 1) // m * m


def _mish_kernel(x):
    # mish(x) = x * tanh(softplus(x)); with e = exp(x):
    #   tanh(log1p(e)) = e*(e+2) / (e*e + 2*e + 2)
    # (no catastrophic cancellation for x << 0, unlike the previous (t*t - 1) form).
    # For x >= 20 tanh(softplus(x)) == 1 in f32, so clamping exp's argument is exact
    # enough and avoids overflow.  Denominator uses the approx EUP reciprocal
    # (one exp + one vrcp per mish; the EUP slot is otherwise idle here).
    e = jnp.exp(jnp.minimum(x, 20.0))
    num = e * (e + 2.0)
    return x * num * pl.reciprocal(num + 2.0, approx=True)


def _mish_ref(x):
    return x * jnp.tanh(jax.nn.softplus(x))


def critic_kernel(s_ref, a_ref, wenc_ref, benc_ref,
                  lnw_ref, lnb_ref, w1_ref, b1_ref, w2_ref, b2_ref,
                  hw_ref, hb_ref, out_ref, tail_scr,
                  *, depth, d_true, act_dim):
    # shared_encoder: s @ W_enc + b_enc (bf16 MXU operands, f32 accumulation).
    enc = (jnp.dot(s_ref[...].astype(jnp.bfloat16), wenc_ref[...],
                   preferred_element_type=jnp.float32) + benc_ref[...])

    # concat([enc, a], -1), zero-padded to d_pad lanes.  Only the (TB, d_pad - in_dim)
    # tail round-trips a VMEM scratch (zero fill + masked store of `a`); the encoder
    # half stays in registers and is joined with a lane-aligned concatenate, removing
    # the full-width zero fill and the enc store+reload of the previous version.
    tail_scr[...] = jnp.zeros_like(tail_scr)
    tail_scr[:, :act_dim] = a_ref[...]
    x = jnp.concatenate([enc, tail_scr[...]], axis=-1)

    inv_n = 1.0 / d_true

    for d in range(depth):  # depth is a small compile-time constant -> static unroll
        residual = x
        # LayerNorm (biased variance, affine).  Padded lanes of x are exactly 0, so the
        # sums over all d_pad lanes equal the true-D sums and no lane mask (vselect) is
        # needed: var = E[x^2] - mean^2.
        mean = jnp.sum(x, axis=-1, keepdims=True) * inv_n
        ex2 = jnp.sum(x * x, axis=-1, keepdims=True) * inv_n
        var = jnp.maximum(ex2 - mean * mean, 0.0)
        xn = (x - mean) * jax.lax.rsqrt(var + LN_EPS) * lnw_ref[d] + lnb_ref[d]
        # Padded lanes of xn are 0 (lnw/lnb padding is 0); padded rows of w1 are 0 too.
        h = _mish_kernel(jnp.dot(xn.astype(jnp.bfloat16), w1_ref[d],
                                 preferred_element_type=jnp.float32) + b1_ref[d])
        # Linear2 (+ dropout == identity at inference), residual, mish.
        y = jnp.dot(h.astype(jnp.bfloat16), w2_ref[d],
                    preferred_element_type=jnp.float32) + b2_ref[d]
        x = _mish_kernel(y + residual)  # padded lanes stay exactly 0 (mish(0) == 0)

    # head Linear(D, 1): VPU multiply + XLU lane reduction instead of an N=1 MXU matmul.
    out_ref[...] = (jnp.sum(x * hw_ref[...], axis=-1, keepdims=True) + hb_ref[...])


def _choose_tile(B):
    # Compute per row is tiny (~65K MACs), so the kernel is dominated by per-grid-step
    # overhead: use the largest batch tile that is still safe for v5e's 16 MiB scoped
    # VMEM default (cap 1024) while keeping >= 2 grid steps whenever B > 128 so
    # dimension_semantics=("parallel",) can put work on both v7x TensorCores.
    if B <= 128:
        return B          # single step; full-extent blocks (pure latency regime anyway)
    return min(1024, _round_up((B + 1) // 2, 128))


def critic_forward(s, a, kparams, *, dims):
    depth = dims["depth"]
    in_dim = dims["in_dim"]
    act_dim = dims["act_dim"]
    d_true = dims["d_true"]
    d_pad = dims["d_pad"]
    B = s.shape[0]

    # The encoder half must be a whole number of lane tiles for the aligned concat.
    assert in_dim % 128 == 0, "in_dim must be a multiple of 128 lanes"

    TB = _choose_tile(B)
    grid = (pl.cdiv(B, TB),)

    def resident(x):  # weights: same block every grid step -> fetched once, VMEM-resident
        nd = x.ndim
        return pl.BlockSpec(x.shape, lambda i, _nd=nd: (0,) * _nd)

    weights = (kparams["w_enc"], kparams["b_enc"],
               kparams["ln_w"], kparams["ln_b"],
               kparams["w1"], kparams["b1"], kparams["w2"], kparams["b2"],
               kparams["head_w"], kparams["head_b"])

    kernel = functools.partial(critic_kernel, depth=depth, d_true=d_true,
                               act_dim=act_dim)

    # Output stays (B, 1): the per-step writeback is <= TB*4 bytes, negligible next to
    # activation traffic, so the lane-dense (1, TB) restructuring was not applied.
    out = pl.pallas_call(
        kernel,
        out_shape=jax.ShapeDtypeStruct((B, 1), jnp.float32),
        grid=grid,
        in_specs=[pl.BlockSpec((TB, s.shape[1]), lambda i: (i, 0)),
                  pl.BlockSpec((TB, a.shape[1]), lambda i: (i, 0))]
                 + [resident(w) for w in weights],
        out_specs=pl.BlockSpec((TB, 1), lambda i: (i, 0)),
        scratch_shapes=[pltpu.VMEM((TB, d_pad - in_dim), jnp.float32)],
        compiler_params=pltpu.CompilerParams(
            dimension_semantics=("parallel",)),  # batch tiles shard across v7x's 2 TCs
    )(s, a, *weights)
    return out[:, 0]  # .squeeze(-1)


def init_params(key, obs_dim, n_assets, in_dim=128, hidden_dim=128, depth=2):
    """Returns (core, kparams, dims): core = true-shape f32 params (reference math),
    kparams = 128-lane-padded / bf16-weight params consumed by the kernel."""
    act_dim = 2 * n_assets
    d_true = in_dim + act_dim
    d_pad = _round_up(d_true, 128)
    ks = jax.random.split(key, 8)

    def lin(k, fan_in, shape):
        bound = 1.0 / jnp.sqrt(jnp.float32(fan_in))
        return jax.random.uniform(k, shape, jnp.float32, -bound, bound)

    core = dict(
        w_enc=lin(ks[0], obs_dim, (obs_dim, in_dim)),
        b_enc=lin(ks[1], obs_dim, (1, in_dim)),
        # LayerNorm defaults: weight=1, bias=0
        ln_w=jnp.ones((depth, 1, d_true), jnp.float32),
        ln_b=jnp.zeros((depth, 1, d_true), jnp.float32),
        w1=lin(ks[2], d_true, (depth, d_true, hidden_dim)),
        b1=lin(ks[3], d_true, (depth, 1, hidden_dim)),
        w2=lin(ks[4], hidden_dim, (depth, hidden_dim, d_true)),
        b2=lin(ks[5], hidden_dim, (depth, 1, d_true)),
        head_w=lin(ks[6], d_true, (d_true, 1)),
        head_b=lin(ks[7], d_true, (1, 1)),
    )

    def pad_last(x, n):
        cfg = [(0, 0)] * (x.ndim - 1) + [(0, n - x.shape[-1])]
        return jnp.pad(x, cfg)

    def pad_axis(x, axis, n):
        cfg = [(0, 0)] * x.ndim
        cfg[axis] = (0, n - x.shape[axis])
        return jnp.pad(x, cfg)

    bf = jnp.bfloat16
    kparams = dict(
        w_enc=core["w_enc"].astype(bf),                      # (obs_dim, in_dim) bf16
        b_enc=core["b_enc"],                                 # (1, in_dim) f32
        ln_w=pad_last(core["ln_w"], d_pad),                  # padded lanes = 0
        ln_b=pad_last(core["ln_b"], d_pad),
        w1=pad_axis(core["w1"], 1, d_pad).astype(bf),        # (depth, d_pad, H) bf16
        b1=core["b1"],                                       # (depth, 1, H) f32
        w2=pad_last(core["w2"], d_pad).astype(bf),           # (depth, H, d_pad) bf16
        b2=pad_last(core["b2"], d_pad),                      # padded lanes = 0
        head_w=pad_last(core["head_w"].T, d_pad),            # (1, d_pad) f32 for VPU reduce
        head_b=core["head_b"],                               # (1, 1) f32
    )
    dims = dict(depth=depth, in_dim=in_dim, act_dim=act_dim,
                d_true=d_true, d_pad=d_pad, hidden_dim=hidden_dim)
    return core, kparams, dims


def critic_reference(s, a, core):
    """Pure-JAX reference of the Critic forward (eval mode) using the same bf16-in /
    f32-accumulate matmul numerics as the kernel (exact mish / exact LayerNorm)."""
    bf = jnp.bfloat16

    def mm(x, w):
        return jnp.dot(x.astype(bf), w.astype(bf), preferred_element_type=jnp.float32)

    x = jnp.concatenate([mm(s, core["w_enc"]) + core["b_enc"], a], axis=-1)
    depth = core["w1"].shape[0]
    for d in range(depth):
        res = x
        mean = x.mean(-1, keepdims=True)
        cent = x - mean
        var = (cent * cent).mean(-1, keepdims=True)
        xn = cent / jnp.sqrt(var + LN_EPS) * core["ln_w"][d] + core["ln_b"][d]
        h = _mish_ref(mm(xn, core["w1"][d]) + core["b1"][d])
        y = mm(h, core["w2"][d]) + core["b2"][d]
        x = _mish_ref(y + res)
    return (x @ core["head_w"] + core["head_b"])[:, 0]


if __name__ == "__main__":
    obs_dim, n_assets = 32, 4
    in_dim, hidden_dim, depth = 128, 128, 2

    key = jax.random.PRNGKey(0)
    k_p, k_data = jax.random.split(key)
    core, kparams, dims = init_params(k_p, obs_dim, n_assets, in_dim, hidden_dim, depth)

    # B=2: single-tile (full-batch block) path.  B=300: multi-tile path with a partial
    # last block (TB=256, grid=2), exercising the new tiling / megacore-friendly rule.
    for B in (2, 300):
        k_s, k_a = jax.random.split(jax.random.fold_in(k_data, B))
        s = jax.random.normal(k_s, (B, obs_dim), jnp.float32)
        a = jax.random.normal(k_a, (B, 2 * n_assets), jnp.float32)

        out = jax.block_until_ready(critic_forward(s, a, kparams, dims=dims))
        ref = critic_reference(s, a, core)

        assert out.shape == (B,), out.shape
        assert jnp.allclose(out, ref, atol=1e-2, rtol=1e-2), (B, out - ref)

    print("KERNEL_OK")
</pallas_src>

<mosaic_0001>
module attributes {stable_mosaic.version = 11 : i64} {
  func.func @critic_kernel(%arg0: i32, %arg1: memref<2x32xf32, #tpu.memory_space<vmem>>, %arg2: memref<2x8xf32, #tpu.memory_space<vmem>>, %arg3: memref<32x128xbf16, #tpu.memory_space<vmem>>, %arg4: memref<1x128xf32, #tpu.memory_space<vmem>>, %arg5: memref<2x1x256xf32, #tpu.memory_space<vmem>>, %arg6: memref<2x1x256xf32, #tpu.memory_space<vmem>>, %arg7: memref<2x256x128xbf16, #tpu.memory_space<vmem>>, %arg8: memref<2x1x128xf32, #tpu.memory_space<vmem>>, %arg9: memref<2x128x256xbf16, #tpu.memory_space<vmem>>, %arg10: memref<2x1x256xf32, #tpu.memory_space<vmem>>, %arg11: memref<1x256xf32, #tpu.memory_space<vmem>>, %arg12: memref<1x1xf32, #tpu.memory_space<vmem>>, %arg13: memref<2x1xf32, #tpu.memory_space<vmem>>, %arg14: memref<2x128xf32, #tpu.memory_space<vmem>>) attributes {dimension_semantics = [#tpu.dimension_semantics<parallel>], iteration_bounds = array<i64: 1>, scalar_prefetch = 0 : i64, scratch_operands = 1 : i64, tpu.core_type = #tpu.core_type<tc>, window_params = [{transform_indices = @transform_0, window_bounds = array<i64: 2, 32>}, {transform_indices = @transform_1, window_bounds = array<i64: 2, 8>}, {pipeline_mode = #tpu.pipeline_mode<synchronous>, transform_indices = @transform_2, window_bounds = array<i64: 32, 128>}, {pipeline_mode = #tpu.pipeline_mode<synchronous>, transform_indices = @transform_3, window_bounds = array<i64: 1, 128>}, {pipeline_mode = #tpu.pipeline_mode<synchronous>, transform_indices = @transform_4, window_bounds = array<i64: 2, 1, 256>}, {pipeline_mode = #tpu.pipeline_mode<synchronous>, transform_indices = @transform_5, window_bounds = array<i64: 2, 1, 256>}, {pipeline_mode = #tpu.pipeline_mode<synchronous>, transform_indices = @transform_6, window_bounds = array<i64: 2, 256, 128>}, {pipeline_mode = #tpu.pipeline_mode<synchronous>, transform_indices = @transform_7, window_bounds = array<i64: 2, 1, 128>}, {pipeline_mode = #tpu.pipeline_mode<synchronous>, transform_indices = @transform_8, window_bounds = array<i64: 2, 128, 256>}, {pipeline_mode = #tpu.pipeline_mode<synchronous>, transform_indices = @transform_9, window_bounds = array<i64: 2, 1, 256>}, {pipeline_mode = #tpu.pipeline_mode<synchronous>, transform_indices = @transform_10, window_bounds = array<i64: 1, 256>}, {pipeline_mode = #tpu.pipeline_mode<synchronous>, transform_indices = @transform_11, window_bounds = array<i64: 1, 1>}, {transform_indices = @transform_12, window_bounds = array<i64: 2, 1>}]} {
    %c0 = arith.constant 0 : index
    %c0_0 = arith.constant 0 : index
    %0 = vector.load %arg1[%c0, %c0_0] : memref<2x32xf32, #tpu.memory_space<vmem>>, vector<2x32xf32>
    %1 = arith.truncf %0 : vector<2x32xf32> to vector<2x32xbf16>
    %c0_1 = arith.constant 0 : index
    %c0_2 = arith.constant 0 : index
    %2 = vector.load %arg3[%c0_1, %c0_2] : memref<32x128xbf16, #tpu.memory_space<vmem>>, vector<32x128xbf16>
    %cst = arith.constant dense<0.000000e+00> : vector<2x128xf32>
    %3 = tpu.matmul %1, %2, %cst {dimension_numbers = #tpu.dot_dimension_numbers<[1], [0], [0], [1], [0, 0, 1, 1], [], []>} : vector<2x32xbf16>, vector<32x128xbf16>, vector<2x128xf32> -> vector<2x128xf32>
    %c0_3 = arith.constant 0 : index
    %c0_4 = arith.constant 0 : index
    %4 = vector.load %arg4[%c0_3, %c0_4] : memref<1x128xf32, #tpu.memory_space<vmem>>, vector<1x128xf32>
    %5 = vector.broadcast %4 : vector<1x128xf32> to vector<2x128xf32>
    %6 = arith.addf %3, %5 : vector<2x128xf32>
    %cst_5 = arith.constant 0.000000e+00 : f32
    %7 = vector.broadcast %cst_5 : f32 to vector<2x128xf32>
    %c0_6 = arith.constant 0 : index
    %c0_7 = arith.constant 0 : index
    %8 = vector.load %arg14[%c0_6, %c0_7] : memref<2x128xf32, #tpu.memory_space<vmem>>, vector<2x128xf32>
    tpu.vector_store %arg14[%c0_6, %c0_7], %7 {strides = array<i32>} : memref<2x128xf32, #tpu.memory_space<vmem>>, vector<2x128xf32>,
    %c0_8 = arith.constant 0 : index
    %c0_9 = arith.constant 0 : index
    %9 = vector.load %arg2[%c0_8, %c0_9] : memref<2x8xf32, #tpu.memory_space<vmem>>, vector<2x8xf32>
    %c0_10 = arith.constant 0 : index
    %c0_11 = arith.constant 0 : index
    %10 = vector.load %arg14[%c0_10, %c0_11] : memref<2x128xf32, #tpu.memory_space<vmem>>, vector<2x8xf32>
    tpu.vector_store %arg14[%c0_10, %c0_11], %9 {strides = array<i32>} : memref<2x128xf32, #tpu.memory_space<vmem>>, vector<2x8xf32>,
    %c0_12 = arith.constant 0 : index
    %c0_13 = arith.constant 0 : index
    %11 = vector.load %arg14[%c0_12, %c0_13] : memref<2x128xf32, #tpu.memory_space<vmem>>, vector<2x128xf32>
    %12 = tpu.concatenate %6, %11 in 1 : vector<2x128xf32>, vector<2x128xf32> -> vector<2x256xf32>
    %cst_14 = arith.constant dense<0.000000e+00> : vector<2xf32>
    %13 = vector.multi_reduction <add>, %12, %cst_14 [1] : vector<2x256xf32> to vector<2xf32>
    %14 = vector.shape_cast %13 : vector<2xf32> to vector<2x1xf32>
    %cst_15 = arith.constant 0.0073529412 : f32
    %15 = vector.broadcast %cst_15 : f32 to vector<2x1xf32>
    %16 = arith.mulf %14, %15 : vector<2x1xf32>
    %17 = arith.mulf %12, %12 : vector<2x256xf32>
    %cst_16 = arith.constant dense<0.000000e+00> : vector<2xf32>
    %18 = vector.multi_reduction <add>, %17, %cst_16 [1] : vector<2x256xf32> to vector<2xf32>
    %19 = vector.shape_cast %18 : vector<2xf32> to vector<2x1xf32>
    %cst_17 = arith.constant 0.0073529412 : f32
    %20 = vector.broadcast %cst_17 : f32 to vector<2x1xf32>
    %21 = arith.mulf %19, %20 : vector<2x1xf32>
    %22 = arith.mulf %16, %16 : vector<2x1xf32>
    %23 = arith.subf %21, %22 : vector<2x1xf32>
    %cst_18 = arith.constant 0.000000e+00 : f32
    %24 = vector.broadcast %cst_18 : f32 to vector<2x1xf32>
    %25 = arith.maximumf %23, %24 : vector<2x1xf32>
    %26 = vector.broadcast %16 : vector<2x1xf32> to vector<2x256xf32>
    %27 = arith.subf %12, %26 : vector<2x256xf32>
    %cst_19 = arith.constant 9.99999974E-6 : f32
    %28 = vector.broadcast %cst_19 : f32 to vector<2x1xf32>
    %29 = arith.addf %25, %28 : vector<2x1xf32>
    %30 = math.rsqrt %29 : vector<2x1xf32>
    %31 = vector.broadcast %30 : vector<2x1xf32> to vector<2x256xf32>
    %32 = arith.mulf %27, %31 : vector<2x256xf32>
    %c0_20 = arith.constant 0 : index
    %c0_21 = arith.constant 0 : index
    %c0_22 = arith.constant 0 : index
    %33 = vector.load %arg5[%c0_20, %c0_21, %c0_22] : memref<2x1x256xf32, #tpu.memory_space<vmem>>, vector<1x1x256xf32>
    %34 = vector.shape_cast %33 : vector<1x1x256xf32> to vector<1x256xf32>
    %35 = vector.broadcast %34 : vector<1x256xf32> to vector<2x256xf32>
    %36 = arith.mulf %32, %35 : vector<2x256xf32>
    %c0_23 = arith.constant 0 : index
    %c0_24 = arith.constant 0 : index
    %c0_25 = arith.constant 0 : index
    %37 = vector.load %arg6[%c0_23, %c0_24, %c0_25] : memref<2x1x256xf32, #tpu.memory_space<vmem>>, vector<1x1x256xf32>
    %38 = vector.shape_cast %37 : vector<1x1x256xf32> to vector<1x256xf32>
    %39 = vector.broadcast %38 : vector<1x256xf32> to vector<2x256xf32>
    %40 = arith.addf %36, %39 : vector<2x256xf32>
    %41 = arith.truncf %40 : vector<2x256xf32> to vector<2x256xbf16>
    %c0_26 = arith.constant 0 : index
    %c0_27 = arith.constant 0 : index
    %c0_28 = arith.constant 0 : index
    %42 = vector.load %arg7[%c0_26, %c0_27, %c0_28] : memref<2x256x128xbf16, #tpu.memory_space<vmem>>, vector<1x256x128xbf16>
    %43 = vector.shape_cast %42 : vector<1x256x128xbf16> to vector<256x128xbf16>
    %cst_29 = arith.constant dense<0.000000e+00> : vector<2x128xf32>
    %44 = tpu.matmul %41, %43, %cst_29 {dimension_numbers = #tpu.dot_dimension_numbers<[1], [0], [0], [1], [0, 0, 1, 1], [], []>} : vector<2x256xbf16>, vector<256x128xbf16>, vector<2x128xf32> -> vector<2x128xf32>
    %c0_30 = arith.constant 0 : index
    %c0_31 = arith.constant 0 : index
    %c0_32 = arith.constant 0 : index
    %45 = vector.load %arg8[%c0_30, %c0_31, %c0_32] : memref<2x1x128xf32, #tpu.memory_space<vmem>>, vector<1x1x128xf32>
    %46 = vector.shape_cast %45 : vector<1x1x128xf32> to vector<1x128xf32>
    %47 = vector.broadcast %46 : vector<1x128xf32> to vector<2x128xf32>
    %48 = arith.addf %44, %47 : vector<2x128xf32>
    %cst_33 = arith.constant 2.000000e+01 : f32
    %49 = vector.broadcast %cst_33 : f32 to vector<2x128xf32>
    %50 = arith.minimumf %48, %49 : vector<2x128xf32>
    %51 = math.exp %50 : vector<2x128xf32>
    %cst_34 = arith.constant 2.000000e+00 : f32
    %52 = vector.broadcast %cst_34 : f32 to vector<2x128xf32>
    %53 = arith.addf %51, %52 : vector<2x128xf32>
    %54 = arith.mulf %51, %53 : vector<2x128xf32>
    %55 = arith.mulf %48, %54 : vector<2x128xf32>
    %cst_35 = arith.constant 2.000000e+00 : f32
    %56 = vector.broadcast %cst_35 : f32 to vector<2x128xf32>
    %57 = arith.addf %54, %56 : vector<2x128xf32>
    %58 = tpu.reciprocal %57 {approx = true} : vector<2x128xf32> -> vector<2x128xf32>
    %59 = arith.mulf %55, %58 : vector<2x128xf32>
    %60 = arith.truncf %59 : vector<2x128xf32> to vector<2x128xbf16>
    %c0_36 = arith.constant 0 : index
    %c0_37 = arith.constant 0 : index
    %c0_38 = arith.constant 0 : index
    %61 = vector.load %arg9[%c0_36, %c0_37, %c0_38] : memref<2x128x256xbf16, #tpu.memory_space<vmem>>, vector<1x128x256xbf16>
    %62 = vector.shape_cast %61 : vector<1x128x256xbf16> to vector<128x256xbf16>
    %cst_39 = arith.constant dense<0.000000e+00> : vector<2x256xf32>
    %63 = tpu.matmul %60, %62, %cst_39 {dimension_numbers = #tpu.dot_dimension_numbers<[1], [0], [0], [1], [0, 0, 1, 1], [], []>} : vector<2x128xbf16>, vector<128x256xbf16>, vector<2x256xf32> -> vector<2x256xf32>
    %c0_40 = arith.constant 0 : index
    %c0_41 = arith.constant 0 : index
    %c0_42 = arith.constant 0 : index
    %64 = vector.load %arg10[%c0_40, %c0_41, %c0_42] : memref<2x1x256xf32, #tpu.memory_space<vmem>>, vector<1x1x256xf32>
    %65 = vector.shape_cast %64 : vector<1x1x256xf32> to vector<1x256xf32>
    %66 = vector.broadcast %65 : vector<1x256xf32> to vector<2x256xf32>
    %67 = arith.addf %63, %66 : vector<2x256xf32>
    %68 = arith.addf %67, %12 : vector<2x256xf32>
    %cst_43 = arith.constant 2.000000e+01 : f32
    %69 = vector.broadcast %cst_43 : f32 to vector<2x256xf32>
    %70 = arith.minimumf %68, %69 : vector<2x256xf32>
    %71 = math.exp %70 : vector<2x256xf32>
    %cst_44 = arith.constant 2.000000e+00 : f32
    %72 = vector.broadcast %cst_44 : f32 to vector<2x256xf32>
    %73 = arith.addf %71, %72 : vector<2x256xf32>
    %74 = arith.mulf %71, %73 : vector<2x256xf32>
    %75 = arith.mulf %68, %74 : vector<2x256xf32>
    %cst_45 = arith.constant 2.000000e+00 : f32
    %76 = vector.broadcast %cst_45 : f32 to vector<2x256xf32>
    %77 = arith.addf %74, %76 : vector<2x256xf32>
    %78 = tpu.reciprocal %77 {approx = true} : vector<2x256xf32> -> vector<2x256xf32>
    %79 = arith.mulf %75, %78 : vector<2x256xf32>
    %cst_46 = arith.constant dense<0.000000e+00> : vector<2xf32>
    %80 = vector.multi_reduction <add>, %79, %cst_46 [1] : vector<2x256xf32> to vector<2xf32>
    %81 = vector.shape_cast %80 : vector<2xf32> to vector<2x1xf32>
    %cst_47 = arith.constant 0.0073529412 : f32
    %82 = vector.broadcast %cst_47 : f32 to vector<2x1xf32>
    %83 = arith.mulf %81, %82 : vector<2x1xf32>
    %84 = arith.mulf %79, %79 : vector<2x256xf32>
    %cst_48 = arith.constant dense<0.000000e+00> : vector<2xf32>
    %85 = vector.multi_reduction <add>, %84, %cst_48 [1] : vector<2x256xf32> to vector<2xf32>
    %86 = vector.shape_cast %85 : vector<2xf32> to vector<2x1xf32>
    %cst_49 = arith.constant 0.0073529412 : f32
    %87 = vector.broadcast %cst_49 : f32 to vector<2x1xf32>
    %88 = arith.mulf %86, %87 : vector<2x1xf32>
    %89 = arith.mulf %83, %83 : vector<2x1xf32>
    %90 = arith.subf %88, %89 : vector<2x1xf32>
    %cst_50 = arith.constant 0.000000e+00 : f32
    %91 = vector.broadcast %cst_50 : f32 to vector<2x1xf32>
    %92 = arith.maximumf %90, %91 : vector<2x1xf32>
    %93 = vector.broadcast %83 : vector<2x1xf32> to vector<2x256xf32>
    %94 = arith.subf %79, %93 : vector<2x256xf32>
    %cst_51 = arith.constant 9.99999974E-6 : f32
    %95 = vector.broadcast %cst_51 : f32 to vector<2x1xf32>
    %96 = arith.addf %92, %95 : vector<2x1xf32>
    %97 = math.rsqrt %96 : vector<2x1xf32>
    %98 = vector.broadcast %97 : vector<2x1xf32> to vector<2x256xf32>
    %99 = arith.mulf %94, %98 : vector<2x256xf32>
    %c1 = arith.constant 1 : index
    %c0_52 = arith.constant 0 : index
    %c0_53 = arith.constant 0 : index
    %100 = vector.load %arg5[%c1, %c0_52, %c0_53] : memref<2x1x256xf32, #tpu.memory_space<vmem>>, vector<1x1x256xf32>
    %101 = vector.shape_cast %100 : vector<1x1x256xf32> to vector<1x256xf32>
    %102 = vector.broadcast %101 : vector<1x256xf32> to vector<2x256xf32>
    %103 = arith.mulf %99, %102 : vector<2x256xf32>
    %c1_54 = arith.constant 1 : index
    %c0_55 = arith.constant 0 : index
    %c0_56 = arith.constant 0 : index
    %104 = vector.load %arg6[%c1_54, %c0_55, %c0_56] : memref<2x1x256xf32, #tpu.memory_space<vmem>>, vector<1x1x256xf32>
    %105 = vector.shape_cast %104 : vector<1x1x256xf32> to vector<1x256xf32>
    %106 = vector.broadcast %105 : vector<1x256xf32> to vector<2x256xf32>
    %107 = arith.addf %103, %106 : vector<2x256xf32>
    %108 = arith.truncf %107 : vector<2x256xf32> to vector<2x256xbf16>
    %c1_57 = arith.constant 1 : index
    %c0_58 = arith.constant 0 : index
    %c0_59 = arith.constant 0 : index
    %109 = vector.load %arg7[%c1_57, %c0_58, %c0_59] : memref<2x256x128xbf16, #tpu.memory_space<vmem>>, vector<1x256x128xbf16>
    %110 = vector.shape_cast %109 : vector<1x256x128xbf16> to vector<256x128xbf16>
    %cst_60 = arith.constant dense<0.000000e+00> : vector<2x128xf32>
    %111 = tpu.matmul %108, %110, %cst_60 {dimension_numbers = #tpu.dot_dimension_numbers<[1], [0], [0], [1], [0, 0, 1, 1], [], []>} : vector<2x256xbf16>, vector<256x128xbf16>, vector<2x128xf32> -> vector<2x128xf32>
    %c1_61 = arith.constant 1 : index
    %c0_62 = arith.constant 0 : index
    %c0_63 = arith.constant 0 : index
    %112 = vector.load %arg8[%c1_61, %c0_62, %c0_63] : memref<2x1x128xf32, #tpu.memory_space<vmem>>, vector<1x1x128xf32>
    %113 = vector.shape_cast %112 : vector<1x1x128xf32> to vector<1x128xf32>
    %114 = vector.broadcast %113 : vector<1x128xf32> to vector<2x128xf32>
    %115 = arith.addf %111, %114 : vector<2x128xf32>
    %cst_64 = arith.constant 2.000000e+01 : f32
    %116 = vector.broadcast %cst_64 : f32 to vector<2x128xf32>
    %117 = arith.minimumf %115, %116 : vector<2x128xf32>
    %118 = math.exp %117 : vector<2x128xf32>
    %cst_65 = arith.constant 2.000000e+00 : f32
    %119 = vector.broadcast %cst_65 : f32 to vector<2x128xf32>
    %120 = arith.addf %118, %119 : vector<2x128xf32>
    %121 = arith.mulf %118, %120 : vector<2x128xf32>
    %122 = arith.mulf %115, %121 : vector<2x128xf32>
    %cst_66 = arith.constant 2.000000e+00 : f32
    %123 = vector.broadcast %cst_66 : f32 to vector<2x128xf32>
    %124 = arith.addf %121, %123 : vector<2x128xf32>
    %125 = tpu.reciprocal %124 {approx = true} : vector<2x128xf32> -> vector<2x128xf32>
    %126 = arith.mulf %122, %125 : vector<2x128xf32>
    %127 = arith.truncf %126 : vector<2x128xf32> to vector<2x128xbf16>
    %c1_67 = arith.constant 1 : index
    %c0_68 = arith.constant 0 : index
    %c0_69 = arith.constant 0 : index
    %128 = vector.load %arg9[%c1_67, %c0_68, %c0_69] : memref<2x128x256xbf16, #tpu.memory_space<vmem>>, vector<1x128x256xbf16>
    %129 = vector.shape_cast %128 : vector<1x128x256xbf16> to vector<128x256xbf16>
    %cst_70 = arith.constant dense<0.000000e+00> : vector<2x256xf32>
    %130 = tpu.matmul %127, %129, %cst_70 {dimension_numbers = #tpu.dot_dimension_numbers<[1], [0], [0], [1], [0, 0, 1, 1], [], []>} : vector<2x128xbf16>, vector<128x256xbf16>, vector<2x256xf32> -> vector<2x256xf32>
    %c1_71 = arith.constant 1 : index
    %c0_72 = arith.constant 0 : index
    %c0_73 = arith.constant 0 : index
    %131 = vector.load %arg10[%c1_71, %c0_72, %c0_73] : memref<2x1x256xf32, #tpu.memory_space<vmem>>, vector<1x1x256xf32>
    %132 = vector.shape_cast %131 : vector<1x1x256xf32> to vector<1x256xf32>
    %133 = vector.broadcast %132 : vector<1x256xf32> to vector<2x256xf32>
    %134 = arith.addf %130, %133 : vector<2x256xf32>
    %135 = arith.addf %134, %79 : vector<2x256xf32>
    %cst_74 = arith.constant 2.000000e+01 : f32
    %136 = vector.broadcast %cst_74 : f32 to vector<2x256xf32>
    %137 = arith.minimumf %135, %136 : vector<2x256xf32>
    %138 = math.exp %137 : vector<2x256xf32>
    %cst_75 = arith.constant 2.000000e+00 : f32
    %139 = vector.broadcast %cst_75 : f32 to vector<2x256xf32>
    %140 = arith.addf %138, %139 : vector<2x256xf32>
    %141 = arith.mulf %138, %140 : vector<2x256xf32>
    %142 = arith.mulf %135, %141 : vector<2x256xf32>
    %cst_76 = arith.constant 2.000000e+00 : f32
    %143 = vector.broadcast %cst_76 : f32 to vector<2x256xf32>
    %144 = arith.addf %141, %143 : vector<2x256xf32>
    %145 = tpu.reciprocal %144 {approx = true} : vector<2x256xf32> -> vector<2x256xf32>
    %146 = arith.mulf %142, %145 : vector<2x256xf32>
    %c0_77 = arith.constant 0 : index
    %c0_78 = arith.constant 0 : index
    %147 = vector.load %arg11[%c0_77, %c0_78] : memref<1x256xf32, #tpu.memory_space<vmem>>, vector<1x256xf32>
    %148 = vector.broadcast %147 : vector<1x256xf32> to vector<2x256xf32>
    %149 = arith.mulf %146, %148 : vector<2x256xf32>
    %cst_79 = arith.constant dense<0.000000e+00> : vector<2xf32>
    %150 = vector.multi_reduction <add>, %149, %cst_79 [1] : vector<2x256xf32> to vector<2xf32>
    %151 = vector.shape_cast %150 : vector<2xf32> to vector<2x1xf32>
    %c0_80 = arith.constant 0 : index
    %c0_81 = arith.constant 0 : index
    %152 = vector.load %arg12[%c0_80, %c0_81] : memref<1x1xf32, #tpu.memory_space<vmem>>, vector<1x1xf32>
    %153 = vector.broadcast %152 : vector<1x1xf32> to vector<2x1xf32>
    %154 = arith.addf %151, %153 : vector<2x1xf32>
    %c0_82 = arith.constant 0 : index
    %c0_83 = arith.constant 0 : index
    %155 = vector.load %arg13[%c0_82, %c0_83] : memref<2x1xf32, #tpu.memory_space<vmem>>, vector<2x1xf32>
    tpu.vector_store %arg13[%c0_82, %c0_83], %154 {strides = array<i32>} : memref<2x1xf32, #tpu.memory_space<vmem>>, vector<2x1xf32>,
    return
  }
  func.func @transform_0(%arg0: i32) -> (i32, i32) {
    %c0_i32 = arith.constant 0 : i32
    %c0_i32_0 = arith.constant 0 : i32
    return %arg0, %c0_i32 : i32, i32
  }
  func.func @transform_1(%arg0: i32) -> (i32, i32) {
    %c0_i32 = arith.constant 0 : i32
    %c0_i32_0 = arith.constant 0 : i32
    return %arg0, %c0_i32 : i32, i32
  }
  func.func @transform_2(%arg0: i32) -> (i32, i32) {
    %c0_i32 = arith.constant 0 : i32
    %c0_i32_0 = arith.constant 0 : i32
    %c0_i32_1 = arith.constant 0 : i32
    return %c0_i32, %c0_i32_0 : i32, i32
  }
  func.func @transform_3(%arg0: i32) -> (i32, i32) {
    %c0_i32 = arith.constant 0 : i32
    %c0_i32_0 = arith.constant 0 : i32
    %c0_i32_1 = arith.constant 0 : i32
    return %c0_i32, %c0_i32_0 : i32, i32
  }
  func.func @transform_4(%arg0: i32) -> (i32, i32, i32) {
    %c0_i32 = arith.constant 0 : i32
    %c0_i32_0 = arith.constant 0 : i32
    %c0_i32_1 = arith.constant 0 : i32
    %c0_i32_2 = arith.constant 0 : i32
    return %c0_i32, %c0_i32_0, %c0_i32_1 : i32, i32, i32
  }
  func.func @transform_5(%arg0: i32) -> (i32, i32, i32) {
    %c0_i32 = arith.constant 0 : i32
    %c0_i32_0 = arith.constant 0 : i32
    %c0_i32_1 = arith.constant 0 : i32
    %c0_i32_2 = arith.constant 0 : i32
    return %c0_i32, %c0_i32_0, %c0_i32_1 : i32, i32, i32
  }
  func.func @transform_6(%arg0: i32) -> (i32, i32, i32) {
    %c0_i32 = arith.constant 0 : i32
    %c0_i32_0 = arith.constant 0 : i32
    %c0_i32_1 = arith.constant 0 : i32
    %c0_i32_2 = arith.constant 0 : i32
    return %c0_i32, %c0_i32_0, %c0_i32_1 : i32, i32, i32
  }
  func.func @transform_7(%arg0: i32) -> (i32, i32, i32) {
    %c0_i32 = arith.constant 0 : i32
    %c0_i32_0 = arith.constant 0 : i32
    %c0_i32_1 = arith.constant 0 : i32
    %c0_i32_2 = arith.constant 0 : i32
    return %c0_i32, %c0_i32_0, %c0_i32_1 : i32, i32, i32
  }
  func.func @transform_8(%arg0: i32) -> (i32, i32, i32) {
    %c0_i32 = arith.constant 0 : i32
    %c0_i32_0 = arith.constant 0 : i32
    %c0_i32_1 = arith.constant 0 : i32
    %c0_i32_2 = arith.constant 0 : i32
    return %c0_i32, %c0_i32_0, %c0_i32_1 : i32, i32, i32
  }
  func.func @transform_9(%arg0: i32) -> (i32, i32, i32) {
    %c0_i32 = arith.constant 0 : i32
    %c0_i32_0 = arith.constant 0 : i32
    %c0_i32_1 = arith.constant 0 : i32
    %c0_i32_2 = arith.constant 0 : i32
    return %c0_i32, %c0_i32_0, %c0_i32_1 : i32, i32, i32
  }
  func.func @transform_10(%arg0: i32) -> (i32, i32) {
    %c0_i32 = arith.constant 0 : i32
    %c0_i32_0 = arith.constant 0 : i32
    %c0_i32_1 = arith.constant 0 : i32
    return %c0_i32, %c0_i32_0 : i32, i32
  }
  func.func @transform_11(%arg0: i32) -> (i32, i32) {
    %c0_i32 = arith.constant 0 : i32
    %c0_i32_0 = arith.constant 0 : i32
    %c0_i32_1 = arith.constant 0 : i32
    return %c0_i32, %c0_i32_0 : i32, i32
  }
  func.func @transform_12(%arg0: i32) -> (i32, i32) {
    %c0_i32 = arith.constant 0 : i32
    %c0_i32_0 = arith.constant 0 : i32
    return %arg0, %c0_i32 : i32, i32
  }
}

</mosaic_0001>

<bundles_post_ra>
// kernel: tpu_custom_call.1
= control target key start
LH: loop header
LB: loop body
LE: loop exit
PB: predicated region body
PF: predicated region fallthrough
CT: control target
= control target key end

     0   :  { %s1618_s0 = inlined_call_operand.hbm [shape: f32[2,32], index: 0, kind: input, shape index: {}]   ;;  %s1619_s1 = inlined_call_operand.hbm [shape: f32[2,8], index: 1, kind: input, shape index: {}]   ;;  %s1620_s2 = inlined_call_operand.hbm [shape: bf16[32,128], index: 2, kind: input, shape index: {}]   ;;  %s1621_s3 = inlined_call_operand.hbm [shape: f32[1,128], index: 3, kind: input, shape index: {}]   ;;  %s1622_s4 = inlined_call_operand.vmem [shape: f32[2,1,256], index: 4, kind: input, shape index: {}]   ;;  %s1623_s5 = inlined_call_operand.vmem [shape: f32[2,1,256], index: 5, kind: input, shape index: {}]   ;;  %s1624_s6 = inlined_call_operand.hbm [shape: bf16[2,256,128], index: 6, kind: input, shape index: {}]   ;;  %s1625_s7 = inlined_call_operand.vmem [shape: f32[2,1,128], index: 7, kind: input, shape index: {}]   ;;  %s1626_s8 = inlined_call_operand.hbm [shape: bf16[2,128,256], index: 8, kind: input, shape index: {}]   ;;  %s1627_s9 = inlined_call_operand.vmem [shape: f32[2,1,256], index: 9, kind: input, shape index: {}]   ;;  %s1628_s10 = inlined_call_operand.vmem [shape: f32[1,256], index: 10, kind: input, shape index: {}]   ;;  %s1629_s11 = inlined_call_operand.<no memory space> [shape: f32[1,1], index: 11, kind: input, shape index: {}]   ;;  %s1630_s12 = inlined_call_operand.vmem [shape: f32[2,1], index: 12, kind: output, shape index: {}]  }
   0x1   :  { %v17_v0 = vstv %s1629_s11 }
   0x2   :  { %18 = vst [vmem:[#allocation3] sm:$0x1] %v17_v0 }
   0x3   :  { %19 = vsyncpa [#allocation5], 0 }
   0x4   :  { %20 = vsyncpa [#allocation7], 0 }
   0x5   :  { %21 = vsyncpa [#allocation10], 0 }
   0x6   :  { %22 = vsyncpa [#allocation13], 0  ;;  %s1433_s23 = smov [#allocation6]   ;;  %s1434_s25 = smov [#allocation9]  }
   0x7   :  { %s39_s24 = sshll.u32 %s1433_s23, 4  ;;  %s61_s26 = sshll.u32 %s1434_s25, 4  ;;  %s40_s24 = int_to_ptr.vmem [resolvable:$true] %s39_s24  ;;  %s62_s26 = int_to_ptr.vmem [resolvable:$true] %s61_s26 }
   0x8   :  { %s1313_s27 = scalar_lea.vmem %s40_s24, 32  ;;  %p1318_p1 = scmp.lt.s32.totalorder %s40_s24, %s40_s24 }
   0x9   :  { %p1314_p0 = scmp.ne.s32.totalorder %s40_s24, %s1313_s27  ;;  %p1319_p2 = scmp.lt.s32.totalorder %s1313_s27, %s1313_s27 }
   0xb   :  { %p1320_p3 = por %p1319_p2, %p1318_p1 }
   0xd   :  { %p1321_p4 = pnand %p1320_p3, %p1314_p0 }
   0xf   :  { %1324 = shalt.err (!%p1321_p4)
}
  0x10   :  { %42 = dma.hbm_to_vmem [thread:$0]  %s1619_s1, 32, %s40_s24, [#allocation7]  }
  0x11   :  { %s1333_s29 = scalar_lea.vmem %s62_s26, 16  ;;  %s1337_s30 = scalar_lea.vmem %s62_s26, 32 }
  0x12   :  { %p1334_p5 = scmp.ne.s32.totalorder %s62_s26, %s1333_s29  ;;  %p1338_p6 = scmp.lt.s32.totalorder %s62_s26, %s62_s26 }
  0x13   :  { %p1339_p7 = scmp.lt.s32.totalorder %s1337_s30, %s1333_s29 }
  0x15   :  { %p1340_p8 = por %p1339_p7, %p1338_p6 }
  0x17   :  { %p1341_p9 = pnand %p1340_p8, %p1334_p5 }
  0x19   :  { %1344 = shalt.err (!%p1341_p9)
}
  0x1a   :  { %64 = dma.hbm_to_vmem [thread:$0]  %s1621_s3, 16, %s62_s26, [#allocation10]  }
  0x1b   :  { %s1435_s15 = smov [#allocation4]   ;;  %s1436_s17 = smov [#allocation8]  }
  0x1c   :  { %s29_s16 = sshll.u32 %s1435_s15, 4  ;;  %s48_s18 = sshll.u32 %s1436_s17, 4  ;;  %s30_s16 = int_to_ptr.vmem [resolvable:$true] %s29_s16  ;;  %s49_s18 = int_to_ptr.vmem [resolvable:$true] %s48_s18 }
  0x1d   :  { %s1353_s19 = scalar_lea.vmem %s30_s16, 32  ;;  %p1358_p11 = scmp.lt.s32.totalorder %s30_s16, %s30_s16 }
  0x1e   :  { %p1354_p10 = scmp.ne.s32.totalorder %s30_s16, %s1353_s19  ;;  %p1359_p12 = scmp.lt.s32.totalorder %s1353_s19, %s1353_s19 }
  0x20   :  { %p1360_p13 = por %p1359_p12, %p1358_p11 }
  0x22   :  { %p1361_p0 = pnand %p1360_p13, %p1354_p10 }
  0x24   :  { %1364 = shalt.err (!%p1361_p0)
}
  0x25   :  { %32 = dma.hbm_to_vmem [thread:$0]  %s1618_s0, 32, %s30_s16, [#allocation5]  }
  0x26   :  { %s1373_s21 = scalar_lea.vmem %s49_s18, 256  ;;  %p1378_p2 = scmp.lt.s32.totalorder %s49_s18, %s49_s18 }
  0x27   :  { %p1374_p1 = scmp.ne.s32.totalorder %s49_s18, %s1373_s21  ;;  %p1379_p3 = scmp.lt.s32.totalorder %s1373_s21, %s1373_s21 }
  0x29   :  { %p1380_p4 = por %p1379_p3, %p1378_p2 }
  0x2b   :  { %p1381_p5 = pnand %p1380_p4, %p1374_p1 }
  0x2d   :  { %1384 = shalt.err (!%p1381_p5)
}
  0x2e   :  { %s1437_s3 = smov 64   ;;  %s1438_s22 = smov 4  }
  0x2f   :  { %54 = dma.hbm_to_vmem [thread:$0]  %s1620_s2, 256, %s49_s18, [#allocation7], %s1437_s3, %s1437_s3, %s1438_s22  }
  0x30   :  { %s1439_s25 = smov [#allocation11]   ;;  %s1440_s27 = smov [#allocation12]  }
  0x31   :  { %s74_s26 = sshll.u32 %s1439_s25, 4  ;;  %s88_s28 = sshll.u32 %s1440_s27, 4  ;;  %s75_s26 = int_to_ptr.vmem [resolvable:$true] %s74_s26  ;;  %s89_s28 = int_to_ptr.vmem [resolvable:$true] %s88_s28 }
  0x32   :  { %s1393_s0 = scalar_lea.vmem %s75_s26, 4096  ;;  %p1398_p7 = scmp.lt.s32.totalorder %s75_s26, %s75_s26 }
  0x33   :  { %p1394_p6 = scmp.ne.s32.totalorder %s75_s26, %s1393_s0  ;;  %p1399_p8 = scmp.lt.s32.totalorder %s1393_s0, %s1393_s0 }
  0x35   :  { %p1400_p9 = por %p1399_p8, %p1398_p7 }
  0x37   :  { %p1401_p10 = pnand %p1400_p9, %p1394_p6 }
  0x39   :  { %1404 = shalt.err (!%p1401_p10)
}
  0x3a   :  { %80 = dma.hbm_to_vmem [thread:$0]  %s1624_s6, 4096, %s75_s26, [#allocation10], %s1437_s3, %s1437_s3, %s1438_s22  }
  0x3b   :  { %s1413_s30 = scalar_lea.vmem %s89_s28, 4096  ;;  %p1418_p12 = scmp.lt.s32.totalorder %s89_s28, %s89_s28 }
  0x3c   :  { %p1414_p11 = scmp.ne.s32.totalorder %s89_s28, %s1413_s30  ;;  %p1419_p13 = scmp.lt.s32.totalorder %s1413_s30, %s1413_s30 }
  0x3e   :  { %p1420_p0 = por %p1419_p13, %p1418_p12 }
  0x40   :  { %p1421_p1 = pnand %p1420_p0, %p1414_p11 }
  0x42   :  { %1424 = shalt.err (!%p1421_p1)
}
  0x43   :  { %s1441_s2 = smov 128   ;;  %s1442_s13 = smov 8  }
  0x44   :  { %94 = dma.hbm_to_vmem [thread:$0]  %s1626_s8, 4096, %s89_s28, [#allocation13], %s1441_s2, %s1441_s2, %s1442_s13  }
  0x45   :  { %1425 = dma.done.wait [#allocation5], 32  }
  0x46   :  { %1426 = vsyncadd [#allocation5], 4294967264 }
  0x47   :  { %1427 = dma.done.wait [#allocation7], 288  }
  0x48   :  { %1428 = vsyncadd [#allocation7], 4294967008 }
  0x49   :  { %1429 = dma.done.wait [#allocation10], 4112  }
  0x4a   :  { %1430 = vsyncadd [#allocation10], 4294963184 }
  0x4b   :  { %1431 = dma.done.wait [#allocation13], 4096  }
  0x4c   :  { %1432 = vsyncadd [#allocation13], 4294963200  ;;  %v1443_v1 = vmov 0.0   ;;  %vm1444_vm0 = vmmov 0   ;;  %vm191_vm1 = vcmask 58368   ;;  %v1195_v3 = vld [vmem:[#allocation8 + $0x8] sm:$0xff]   ;;  %v220_v46 = vlaneseq }
  0x4d   :  { %1174 = vmatprep.subr.bf16.mxu0 %v1443_v1  ;;  %189 = vst [vmem:[#allocation2] sm:$0x3] %v1443_v1  ;;  %1178 = vmatprep.mubr.msk.bf16.mxu0 %vm1444_vm0, %v1443_v1  ;;  %v190_v2 = vld [vmem:[#allocation6] sm:$0x3]  ;;  %v1196_v4 = vld [vmem:[#allocation8] sm:$0xff]   ;;  %vm145_vm2 = vcmask 261120  }
  0x4e   :  { %192 = vst.msk [vmem:[#allocation2] sm:$0x3] %vm191_vm1, %v190_v2  ;;  %v120_v5 = vld [vmem:[#allocation4] sm:$0x3]  ;;  %1175 = vmatpush3.bf16.msra.mxu0 %v1195_v3  ;;  %v1052_v7 = vld [vmem:[#allocation9] ss:$0 sm:$0xff] }
  0x4f   :  { %1176 = vmatprep.subr.bf16.mxu0 %v1443_v1  ;;  %v121_v6 = vpack.c.bf16 %v120_v5, %v120_v5  ;;  %vm194_vm3 = vcmask 1041408   ;;  %v1197_v22 = vld [vmem:[#allocation11 + $0x78] sm:$0xff]   ;;  %v1199_v24 = vld [vmem:[#allocation11 + $0x70] sm:$0xff]   ;;  %v1201_v26 = vld [vmem:[#allocation11 + $0x68] sm:$0xff]   ;;  %v221_v47 = vshrl.u32 %v220_v46, 7  ;;  %vm1042_vm4 = vcmask 1024  }
  0x50   :  { %v1198_v23 = vld [vmem:[#allocation11 + $0x38] sm:$0xff]   ;;  %1130 = vmatprep.subr.bf16.mxu1 %v1197_v22  ;;  %v1200_v25 = vld [vmem:[#allocation11 + $0x30] sm:$0xff]   ;;  %v1202_v27 = vld [vmem:[#allocation11 + $0x28] sm:$0xff]  }
  0x51   :  { %1131 = vmatpush3.bf16.msra.mxu1 %v1198_v23  ;;  %v1203_v28 = vld [vmem:[#allocation11 + $0x60] sm:$0xff]   ;;  %v1205_v30 = vld [vmem:[#allocation11 + $0x58] sm:$0xff]   ;;  %v1207_v32 = vld [vmem:[#allocation11 + $0x50] sm:$0xff]   ;;  %v1546_v48 = vsub.s32 0, %v221_v47  ;;  %v1548_v49 = vsub.s32 1, %v221_v47 }
  0x52   :  { %1177 = vmatpush3.bf16.msra.mxu0 %v1196_v4  ;;  %1132 = vmatprep.subr.bf16.mxu1 %v1199_v24  ;;  %v1204_v29 = vld [vmem:[#allocation11 + $0x20] sm:$0xff]   ;;  %v1206_v31 = vld [vmem:[#allocation11 + $0x18] sm:$0xff]   ;;  %v1208_v33 = vld [vmem:[#allocation11 + $0x10] sm:$0xff]  }
  0x53   :  { %v1209_v34 = vld [vmem:[#allocation11 + $0x48] sm:$0xff]   ;;  %v1211_v36 = vld [vmem:[#allocation11 + $0x40] sm:$0xff]   ;;  %v1215_v3 = vld [vmem:[#allocation12 + $0x74] ss:$8 sps:$4 sm:$0xff]  }
  0x54   :  { %v1210_v35 = vld [vmem:[#allocation11 + $0x8] sm:$0xff]   ;;  %v1212_v37 = vld [vmem:[#allocation11] sm:$0xff]   ;;  %v1213_v4 = vld [vmem:[#allocation12 + $0x70] ss:$8 sps:$4 sm:$0xff]   ;;  %541 = vmatprep.subr.bf16.mxu0 %v1215_v3 }
  0x55   :  { %1179 = vmatmul.mubr.msk.bf16.vlgmr.msra.gmra.mxu0 %vm145_vm2, %v121_v6  ;;  %v1532_v8 = vld [vmem:[#allocation2] sm:$0x3]  ;;  %1133 = vmatpush3.bf16.msra.mxu1 %v1200_v25 }
  0x56   :  { %v196_v11 = vsel %vm194_vm3, %v1532_v8, 0.0  ;;  %v202_v12 = vmul.f32 %v1532_v8, %v1532_v8  ;;  %1134 = vmatprep.subr.bf16.mxu1 %v1201_v26  ;;  %v218_v50 = vld [vmem:[%s1622_s4] sm:$0x3]  ;;  %542 = vmatpush1.bf16.msra.mxu0 %v1213_v4 }
  0x57   :  { %v232_v51 = vld [vmem:[%s1623_s5] sm:$0x3]  ;;  %v223_v54 = vrot.slane %v218_v50, %v1546_v48  ;;  %v227_v55 = vrot.slane %v218_v50, %v1548_v49 }
  0x58   :  { %v204_v19 = vsel %vm194_vm3, %v202_v12, 0.0  ;;  %v237_v58 = vrot.slane %v232_v51, %v1546_v48  ;;  %v241_v59 = vrot.slane %v232_v51, %v1548_v49  ;;  %v1218_v5 = vld [vmem:[#allocation12 + $0x64] ss:$8 sps:$4 sm:$0xff]   ;;  %v1216_v6 = vld [vmem:[#allocation12 + $0x60] ss:$8 sps:$4 sm:$0xff]  }
  0x59   :  { %1135 = vmatpush3.bf16.msra.mxu1 %v1202_v27  ;;  %543 = vmatprep.subr.bf16.mxu0 %v1218_v5  ;;  %v1222_v12 = vld [vmem:[#allocation12 + $0x40] ss:$8 sps:$4 sm:$0xff]   ;;  %v1056_v23 = vld [vmem:[%s1625_s7] ss:$0 sm:$0xff] }
  0x5a   :  { %1136 = vmatprep.subr.bf16.mxu1 %v1203_v28  ;;  %544 = vmatpush1.bf16.msra.mxu0 %v1216_v6 }
  0x5d   :  { %1137 = vmatpush3.bf16.msra.mxu1 %v1204_v29 }
  0x5e   :  { %1138 = vmatprep.subr.bf16.mxu1 %v1205_v30 }
  0x61   :  { %1139 = vmatpush3.bf16.msra.mxu1 %v1206_v31 }
  0x62   :  { %1140 = vmatprep.subr.bf16.mxu1 %v1207_v32 }
  0x65   :  { %1141 = vmatpush3.bf16.msra.mxu1 %v1208_v33 }
  0x66   :  { %1142 = vmatprep.subr.bf16.mxu1 %v1209_v34 }
  0x69   :  { %1143 = vmatpush3.bf16.msra.mxu1 %v1210_v35 }
  0x6a   :  { %1144 = vmatprep.subr.bf16.mxu1 %v1211_v36 }
  0x6d   :  { %1145 = vmatpush3.bf16.msra.mxu1 %v1212_v37 }
 0x115   :  { %v183_v9 = vpop.f32.mrf.mxu0 }
 0x116   :  { %v1534_v10 = vadd.f32 %v1052_v7, %v183_v9  ;;  %v1221_v7 = vld [vmem:[#allocation12 + $0x54] ss:$8 sps:$4 sm:$0xff]   ;;  %v1219_v9 = vld [vmem:[#allocation12 + $0x50] ss:$8 sps:$4 sm:$0xff]  }
 0x117   :  { %v1180_v13 = vpop.f32.mrf.mxu0  ;;  %545 = vmatprep.subr.bf16.mxu0 %v1221_v7 }
 0x118   :  { %v195_v14 = vsel %vm194_vm3, %v1534_v10, 0.0  ;;  %v201_v15 = vmul.f32 %v1534_v10, %v1534_v10  ;;  %546 = vmatpush1.bf16.msra.mxu0 %v1219_v9  ;;  %v1227_v13 = vld [vmem:[#allocation12 + $0x34] ss:$8 sps:$4 sm:$0xff]  }
 0x119   :  { %v186_v16 = vpop.f32.mrf.mxu0  ;;  %v197_v17 = vadd.f32 %v196_v11, %v195_v14  ;;  %v1224_v11 = vld [vmem:[#allocation12 + $0x44] ss:$8 sps:$4 sm:$0xff]   ;;  %v1225_v14 = vld [vmem:[#allocation12 + $0x30] ss:$8 sps:$4 sm:$0xff]  }
 0x11a   :  { %v203_v18 = vsel %vm194_vm3, %v201_v15, 0.0  ;;  %547 = vmatprep.subr.bf16.mxu0 %v1224_v11  ;;  %v1230_v15 = vld [vmem:[#allocation12 + $0x24] ss:$8 sps:$4 sm:$0xff]   ;;  %v1228_v16 = vld [vmem:[#allocation12 + $0x20] ss:$8 sps:$4 sm:$0xff]  }
 0x11b   :  { %198 = vadd.xlane.f32.xlu0 %v197_v17  ;;  %v1181_v20 = vpop.f32.mrf.mxu0  ;;  %v205_v21 = vadd.f32 %v204_v19, %v203_v18  ;;  %v1233_v17 = vld [vmem:[#allocation12 + $0x14] ss:$8 sps:$4 sm:$0xff]   ;;  %v1231_v18 = vld [vmem:[#allocation12 + $0x10] ss:$8 sps:$4 sm:$0xff]   ;;  %v1236_v19 = vld [vmem:[#allocation12 + $0x4] ss:$8 sps:$4 sm:$0xff]  }
 0x11c   :  { %548 = vmatpush1.bf16.msra.mxu0 %v1222_v12  ;;  %v1234_v20 = vld [vmem:[#allocation12] ss:$8 sps:$4 sm:$0xff]  }
 0x11d   :  { %549 = vmatprep.subr.bf16.mxu0 %v1227_v13 }
 0x11f   :  { %206 = vadd.xlane.f32.xlu0 %v205_v21  ;;  %v1445_v21 = vmov 0  }
 0x120   :  { %550 = vmatpush1.bf16.msra.mxu0 %v1225_v14  ;;  %573 = vmatprep.mubr.bf16.mxu0 %v1445_v21  ;;  %v1237_v14 = vld [vmem:[#allocation11 + $0xf8] sm:$0xff]  }
 0x121   :  { %551 = vmatprep.subr.bf16.mxu0 %v1230_v15  ;;  %v1238_v15 = vld [vmem:[#allocation11 + $0xb8] sm:$0xff]   ;;  %1152 = vmatprep.subr.bf16.mxu1 %v1237_v14 }
 0x124   :  { %552 = vmatpush1.bf16.msra.mxu0 %v1228_v16  ;;  %v1239_v16 = vld [vmem:[#allocation11 + $0xf0] sm:$0xff]  }
 0x125   :  { %553 = vmatprep.subr.bf16.mxu0 %v1233_v17  ;;  %v1240_v17 = vld [vmem:[#allocation11 + $0xb0] sm:$0xff]  }
 0x128   :  { %554 = vmatpush1.bf16.msra.mxu0 %v1231_v18  ;;  %v1241_v18 = vld [vmem:[#allocation11 + $0xe8] sm:$0xff]  }
 0x129   :  { %555 = vmatprep.subr.bf16.mxu0 %v1236_v19  ;;  %v1242_v19 = vld [vmem:[#allocation11 + $0xa8] sm:$0xff]  }
 0x12c   :  { %556 = vmatpush1.bf16.msra.mxu0 %v1234_v20  ;;  %v1243_v20 = vld [vmem:[#allocation11 + $0xe0] sm:$0xff]  }
 0x1a4   :  { %v199_v38 = vpop.xlane.xlu0 %198 }
 0x1a5   :  { %v200_v39 = vmul.f32 0.007352941, %v199_v38 }
 0x1a7   :  { %v209_v41 = vmul.f32 %v200_v39, %v200_v39  ;;  %v212_v52 = vsub.f32 %v1534_v10, %v200_v39  ;;  %v213_v53 = vsub.f32 %v1532_v8, %v200_v39  ;;  %v449_v39 = vld [vmem:[%s1627_s9] sm:$0x3] }
 0x1a8   :  { %v207_v40 = vpop.xlane.xlu0 %206 }
 0x1a9   :  { %v208_v42 = vmul.f32 0.007352941, %v207_v40  ;;  %v454_v40 = vrot.slane %v449_v39, %v1546_v48 }
 0x1ab   :  { %v210_v43 = vsub.f32 %v208_v42, %v209_v41  ;;  %v458_v41 = vrot.slane %v449_v39, %v1548_v49  ;;  %v1090_v39 = vld [vmem:[%s1623_s5 + $0x2] sm:$0x3] }
 0x1ad   :  { %v211_v44 = vmax.f32 %v210_v43, 0.0 }
 0x1af   :  { %v214_v45 = vadd.f32 1e-05, %v211_v44 }
 0x1b1   :  { %1277 = vrsqrt.f32 %v214_v45 }
 0x1be   :  { %v1278_v56 = vpop.eup %1277 }
 0x1bf   :  { %v217_v57 = vmul.f32 %v1278_v56, %v213_v53  ;;  %v216_v60 = vmul.f32 %v1278_v56, %v212_v52 }
 0x1c1   :  { %v231_v61 = vmul.f32 %v227_v55, %v217_v57  ;;  %v230_v62 = vmul.f32 %v223_v54, %v216_v60 }
 0x1c3   :  { %v245_v63 = vadd.f32 %v241_v59, %v231_v61  ;;  %v244_v0 = vadd.f32 %v237_v58, %v230_v62 }
 0x1c5   :  { %v247_v1 = vpack.c.bf16 %v245_v63, %v245_v63  ;;  %v246_v2 = vpack.c.bf16 %v244_v0, %v244_v0 }
 0x1c7   :  { %415 = vmatprep.mubr.bf16.mxu1 %v247_v1 }
 0x1c8   :  { %416 = vmatmul.mubr.bf16.vlgmr.msra.gmra.mxu1 %v246_v2 }
 0x1c9   :  { %1153 = vmatpush3.bf16.msra.mxu1 %v1238_v15 }
 0x1ca   :  { %1154 = vmatprep.subr.bf16.mxu1 %v1239_v16 }
 0x1cd   :  { %1155 = vmatpush3.bf16.msra.mxu1 %v1240_v17 }
 0x1ce   :  { %1156 = vmatprep.subr.bf16.mxu1 %v1241_v18 }
 0x1d1   :  { %1157 = vmatpush3.bf16.msra.mxu1 %v1242_v19 }
 0x1d2   :  { %1158 = vmatprep.subr.bf16.mxu1 %v1243_v20 }
 0x288   :  { %v1146_v22 = vpop.f32.mrf.mxu1 }
 0x28a   :  { %v1147_v24 = vpop.f32.mrf.mxu1 }
 0x28b   :  { %v1148_v25 = vadd.f32 %v1147_v24, %v1146_v22  ;;  %v1245_v22 = vld [vmem:[#allocation11 + $0xd8] sm:$0xff]   ;;  %v1247_v24 = vld [vmem:[#allocation11 + $0xd0] sm:$0xff]  }
 0x28c   :  { %v1149_v26 = vpop.f32.mrf.mxu1 }
 0x28d   :  { %v418_v27 = vadd.f32 %v1148_v25, %v1056_v23  ;;  %v1246_v23 = vld [vmem:[#allocation11 + $0x98] sm:$0xff]   ;;  %v1248_v25 = vld [vmem:[#allocation11 + $0x90] sm:$0xff]   ;;  %v1249_v26 = vld [vmem:[#allocation11 + $0xc8] sm:$0xff]  }
 0x28e   :  { %v1150_v28 = vpop.f32.mrf.mxu1 }
 0x28f   :  { %v423_v29 = vmin.f32 %v418_v27, 20.0  ;;  %v1251_v28 = vld [vmem:[#allocation11 + $0xc0] sm:$0xff]  }
 0x291   :  { %v424_v30 = vmul.f32 1.442695, %v423_v29  ;;  %v1252_v29 = vld [vmem:[#allocation11 + $0x80] sm:$0xff]  }
 0x293   :  { %1279 = vpow2.f32 %v424_v30 }
 0x2a0   :  { %v1280_v31 = vpop.eup %1279 }
 0x2a1   :  { %v426_v32 = vadd.f32 2.0, %v1280_v31 }
 0x2a3   :  { %v427_v33 = vmul.f32 %v1280_v31, %v426_v32 }
 0x2a5   :  { %v429_v34 = vadd.f32 2.0, %v427_v33  ;;  %v428_v35 = vmul.f32 %v427_v33, %v418_v27  ;;  %v1250_v27 = vld [vmem:[#allocation11 + $0x88] sm:$0xff]  }
 0x2a7   :  { %1281 = vrcp.f32 %v429_v34 }
 0x2b4   :  { %v1282_v36 = vpop.eup %1281 }
 0x2b5   :  { %v431_v37 = vmul.f32 %v1282_v36, %v428_v35 }
 0x2b7   :  { %v432_v38 = vpack.c.bf16 %v431_v37, %v431_v37 }
 0x2b9   :  { %574 = vmatmul.mubr.bf16.vlgmr.msra.gmra.mxu0 %v432_v38  ;;  %v1089_v38 = vld [vmem:[%s1622_s4 + $0x2] sm:$0x3] }
 0x2ba   :  { %986 = vmatprep.mubr.bf16.mxu0 %v1445_v21  ;;  %v1244_v21 = vld [vmem:[#allocation11 + $0xa0] sm:$0xff]  }
 0x2bb   :  { %1159 = vmatpush3.bf16.msra.mxu1 %v1244_v21 }
 0x2bc   :  { %1160 = vmatprep.subr.bf16.mxu1 %v1245_v22 }
 0x2bf   :  { %1161 = vmatpush3.bf16.msra.mxu1 %v1246_v23 }
 0x2c0   :  { %1162 = vmatprep.subr.bf16.mxu1 %v1247_v24 }
 0x2c3   :  { %1163 = vmatpush3.bf16.msra.mxu1 %v1248_v25 }
 0x2c4   :  { %1164 = vmatprep.subr.bf16.mxu1 %v1249_v26 }
 0x2c7   :  { %1165 = vmatpush3.bf16.msra.mxu1 %v1250_v27 }
 0x2c8   :  { %1166 = vmatprep.subr.bf16.mxu1 %v1251_v28  ;;  %v1109_v28 = vld [vmem:[%s1627_s9 + $0x2] sm:$0x3] }
 0x2cb   :  { %1167 = vmatpush3.bf16.msra.mxu1 %v1252_v29  ;;  %v867_v29 = vrot.slane %v1109_v28, %v1546_v48 }
 0x379   :  { %v575_v42 = vpop.f32.mrf.mxu0 }
 0x37a   :  { %v576_v43 = vadd.f32 %v575_v42, %v454_v40  ;;  %v631_v42 = vrot.slane %v1089_v38, %v1546_v48 }
 0x37b   :  { %v577_v44 = vpop.f32.mrf.mxu0 }
 0x37c   :  { %v582_v45 = vadd.f32 %v576_v43, %v1534_v10  ;;  %v578_v46 = vadd.f32 %v577_v44, %v458_v41  ;;  %v635_v43 = vrot.slane %v1089_v38, %v1548_v49 }
 0x37d   :  { %v579_v47 = vpop.f32.mrf.mxu0 }
 0x37e   :  { %v584_v50 = vmin.f32 %v582_v45, 20.0  ;;  %v583_v51 = vadd.f32 %v578_v46, %v1532_v8  ;;  %v646_v46 = vrot.slane %v1090_v39, %v1546_v48  ;;  %v650_v47 = vrot.slane %v1090_v39, %v1548_v49 }
 0x37f   :  { %v580_v52 = vpop.f32.mrf.mxu0 }
 0x380   :  { %v586_v53 = vmul.f32 1.442695, %v584_v50  ;;  %v585_v54 = vmin.f32 %v583_v51, 20.0 }
 0x382   :  { %1283 = vpow2.f32 %v586_v53  ;;  %v588_v55 = vmul.f32 1.442695, %v585_v54 }
 0x384   :  { %1285 = vpow2.f32 %v588_v55 }
 0x38f   :  { %v1284_v56 = vpop.eup %1283 }
 0x390   :  { %v590_v57 = vadd.f32 2.0, %v1284_v56 }
 0x391   :  { %v1286_v58 = vpop.eup %1285 }
 0x392   :  { %v592_v59 = vmul.f32 %v1284_v56, %v590_v57  ;;  %v591_v60 = vadd.f32 2.0, %v1286_v58  ;;  %v1255_v57 = vld [vmem:[#allocation12 + $0xf4] ss:$8 sps:$4 sm:$0xff]  }
 0x393   :  { %954 = vmatprep.subr.bf16.mxu0 %v1255_v57 }
 0x394   :  { %v596_v61 = vadd.f32 2.0, %v592_v59  ;;  %v593_v62 = vmul.f32 %v1286_v58, %v591_v60  ;;  %v594_v63 = vmul.f32 %v592_v59, %v582_v45  ;;  %v1253_v58 = vld [vmem:[#allocation12 + $0xf0] ss:$8 sps:$4 sm:$0xff]   ;;  %v1258_v59 = vld [vmem:[#allocation12 + $0xe4] ss:$8 sps:$4 sm:$0xff]  }
 0x395   :  { %955 = vmatpush1.bf16.msra.mxu0 %v1253_v58  ;;  %v1256_v60 = vld [vmem:[#allocation12 + $0xe0] ss:$8 sps:$4 sm:$0xff]  }
 0x396   :  { %1287 = vrcp.f32 %v596_v61  ;;  %v597_v10 = vadd.f32 2.0, %v593_v62  ;;  %v595_v8 = vmul.f32 %v593_v62, %v583_v51  ;;  %956 = vmatprep.subr.bf16.mxu0 %v1258_v59  ;;  %v1261_v61 = vld [vmem:[#allocation12 + $0xd4] ss:$8 sps:$4 sm:$0xff]   ;;  %v1259_v62 = vld [vmem:[#allocation12 + $0xd0] ss:$8 sps:$4 sm:$0xff]  }
 0x398   :  { %1289 = vrcp.f32 %v597_v10  ;;  %v1264_v10 = vld [vmem:[#allocation12 + $0xc4] ss:$8 sps:$4 sm:$0xff]  }
 0x399   :  { %957 = vmatpush1.bf16.msra.mxu0 %v1256_v60 }
 0x39a   :  { %958 = vmatprep.subr.bf16.mxu0 %v1261_v61 }
 0x39d   :  { %959 = vmatpush1.bf16.msra.mxu0 %v1259_v62 }
 0x39e   :  { %960 = vmatprep.subr.bf16.mxu0 %v1264_v10 }
 0x3a3   :  { %v1288_v0 = vpop.eup %1287 }
 0x3a4   :  { %v1572_v1 = vmul.f32 %v1288_v0, %v594_v63  ;;  %v1262_v63 = vld [vmem:[#allocation12 + $0xc0] ss:$8 sps:$4 sm:$0xff]   ;;  %v1267_v0 = vld [vmem:[#allocation12 + $0xb4] ss:$8 sps:$4 sm:$0xff]  }
 0x3a5   :  { %v1290_v2 = vpop.eup %1289  ;;  %961 = vmatpush1.bf16.msra.mxu0 %v1262_v63 }
 0x3a6   :  { %v1574_v3 = vmul.f32 %v1290_v2, %v595_v8  ;;  %v602_v4 = vsel %vm194_vm3, %v1572_v1, 0.0  ;;  %v608_v6 = vmul.f32 %v1572_v1, %v1572_v1  ;;  %v1265_v8 = vld [vmem:[#allocation12 + $0xb0] ss:$8 sps:$4 sm:$0xff]   ;;  %962 = vmatprep.subr.bf16.mxu0 %v1267_v0  ;;  %v1270_v2 = vld [vmem:[#allocation12 + $0xa4] ss:$8 sps:$4 sm:$0xff]  }
 0x3a7   :  { %v1126_v0 = vld [vmem:[#allocation3] ss:$0 sm:$0xff] }
 0x3a8   :  { %v603_v5 = vsel %vm194_vm3, %v1574_v3, 0.0  ;;  %v609_v7 = vmul.f32 %v1574_v3, %v1574_v3  ;;  %v610_v12 = vsel %vm194_vm3, %v608_v6, 0.0  ;;  %v1271_v6 = vld [vmem:[#allocation12 + $0x90] ss:$8 sps:$4 sm:$0xff]  }
 0x3a9   :  { %v604_v9 = vadd.f32 %v603_v5, %v602_v4  ;;  %963 = vmatpush1.bf16.msra.mxu0 %v1265_v8  ;;  %v1268_v4 = vld [vmem:[#allocation12 + $0xa0] ss:$8 sps:$4 sm:$0xff]   ;;  %v1273_v5 = vld [vmem:[#allocation12 + $0x94] ss:$8 sps:$4 sm:$0xff]  }
 0x3aa   :  { %v611_v11 = vsel %vm194_vm3, %v609_v7, 0.0  ;;  %964 = vmatprep.subr.bf16.mxu0 %v1270_v2  ;;  %v1276_v7 = vld [vmem:[#allocation12 + $0x84] ss:$8 sps:$4 sm:$0xff]  }
 0x3ab   :  { %605 = vadd.xlane.f32.xlu1 %v604_v9  ;;  %v612_v13 = vadd.f32 %v611_v11, %v610_v12  ;;  %v1274_v9 = vld [vmem:[#allocation12 + $0x80] ss:$8 sps:$4 sm:$0xff]  }
 0x3ac   :  { %v1092_v12 = vld [vmem:[%s1625_s7 + $0x1] ss:$0 sm:$0xff] }
 0x3ad   :  { %965 = vmatpush1.bf16.msra.mxu0 %v1268_v4 }
 0x3ae   :  { %966 = vmatprep.subr.bf16.mxu0 %v1273_v5 }
 0x3af   :  { %613 = vadd.xlane.f32.xlu1 %v612_v13 }
 0x3b1   :  { %967 = vmatpush1.bf16.msra.mxu0 %v1271_v6 }
 0x3b2   :  { %968 = vmatprep.subr.bf16.mxu0 %v1276_v7 }
 0x3b5   :  { %969 = vmatpush1.bf16.msra.mxu0 %v1274_v9 }
 0x434   :  { %v606_v30 = vpop.xlane.xlu1 %605 }
 0x435   :  { %v607_v31 = vmul.f32 0.007352941, %v606_v30  ;;  %v871_v30 = vrot.slane %v1109_v28, %v1548_v49 }
 0x437   :  { %v616_v33 = vmul.f32 %v607_v31, %v607_v31  ;;  %v619_v40 = vsub.f32 %v1572_v1, %v607_v31  ;;  %v620_v41 = vsub.f32 %v1574_v3, %v607_v31 }
 0x438   :  { %v614_v32 = vpop.xlane.xlu1 %613 }
 0x439   :  { %v615_v34 = vmul.f32 0.007352941, %v614_v32 }
 0x43b   :  { %v617_v35 = vsub.f32 %v615_v34, %v616_v33 }
 0x43d   :  { %v618_v36 = vmax.f32 %v617_v35, 0.0 }
 0x43f   :  { %v621_v37 = vadd.f32 1e-05, %v618_v36 }
 0x441   :  { %1291 = vrsqrt.f32 %v621_v37 }
 0x44e   :  { %v1292_v44 = vpop.eup %1291 }
 0x44f   :  { %v624_v45 = vmul.f32 %v1292_v44, %v620_v41  ;;  %v623_v50 = vmul.f32 %v1292_v44, %v619_v40 }
 0x451   :  { %v639_v51 = vmul.f32 %v635_v43, %v624_v45  ;;  %v638_v52 = vmul.f32 %v631_v42, %v623_v50 }
 0x453   :  { %v654_v53 = vadd.f32 %v650_v47, %v639_v51  ;;  %v653_v54 = vadd.f32 %v646_v46, %v638_v52 }
 0x455   :  { %v656_v55 = vpack.c.bf16 %v654_v53, %v654_v53  ;;  %v655_v56 = vpack.c.bf16 %v653_v54, %v653_v54 }
 0x457   :  { %826 = vmatprep.mubr.bf16.mxu1 %v656_v55 }
 0x458   :  { %827 = vmatmul.mubr.bf16.vlgmr.msra.gmra.mxu1 %v655_v56 }
 0x518   :  { %v1168_v11 = vpop.f32.mrf.mxu1 }
 0x51a   :  { %v1169_v13 = vpop.f32.mrf.mxu1 }
 0x51b   :  { %v1170_v14 = vadd.f32 %v1169_v13, %v1168_v11 }
 0x51c   :  { %v1171_v15 = vpop.f32.mrf.mxu1 }
 0x51d   :  { %v829_v16 = vadd.f32 %v1170_v14, %v1092_v12 }
 0x51e   :  { %v1172_v17 = vpop.f32.mrf.mxu1 }
 0x51f   :  { %v834_v18 = vmin.f32 %v829_v16, 20.0 }
 0x521   :  { %v835_v19 = vmul.f32 1.442695, %v834_v18 }
 0x523   :  { %1293 = vpow2.f32 %v835_v19 }
 0x530   :  { %v1294_v20 = vpop.eup %1293 }
 0x531   :  { %v837_v21 = vadd.f32 2.0, %v1294_v20 }
 0x533   :  { %v838_v22 = vmul.f32 %v1294_v20, %v837_v21 }
 0x535   :  { %v840_v23 = vadd.f32 2.0, %v838_v22  ;;  %v839_v24 = vmul.f32 %v838_v22, %v829_v16 }
 0x537   :  { %1295 = vrcp.f32 %v840_v23 }
 0x544   :  { %v1296_v25 = vpop.eup %1295 }
 0x545   :  { %v842_v26 = vmul.f32 %v1296_v25, %v839_v24 }
 0x547   :  { %v843_v27 = vpack.c.bf16 %v842_v26, %v842_v26 }
 0x549   :  { %987 = vmatmul.mubr.bf16.vlgmr.msra.gmra.mxu0 %v843_v27 }
 0x609   :  { %v988_v31 = vpop.f32.mrf.mxu0 }
 0x60a   :  { %v989_v32 = vadd.f32 %v988_v31, %v867_v29 }
 0x60b   :  { %v990_v33 = vpop.f32.mrf.mxu0 }
 0x60c   :  { %v995_v34 = vadd.f32 %v989_v32, %v1572_v1  ;;  %v991_v35 = vadd.f32 %v990_v33, %v871_v30 }
 0x60d   :  { %v992_v36 = vpop.f32.mrf.mxu0 }
 0x60e   :  { %v997_v37 = vmin.f32 %v995_v34, 20.0  ;;  %v996_v38 = vadd.f32 %v991_v35, %v1574_v3  ;;  %v1015_v3 = vld [vmem:[%s1628_s10] sm:$0x3] }
 0x60f   :  { %v993_v39 = vpop.f32.mrf.mxu0  ;;  %v1020_v53 = vrot.slane %v1015_v3, %v1546_v48  ;;  %v1024_v57 = vrot.slane %v1015_v3, %v1548_v49 }
 0x610   :  { %v999_v40 = vmul.f32 1.442695, %v997_v37  ;;  %v998_v41 = vmin.f32 %v996_v38, 20.0 }
 0x612   :  { %1297 = vpow2.f32 %v999_v40  ;;  %v1001_v42 = vmul.f32 1.442695, %v998_v41 }
 0x614   :  { %1299 = vpow2.f32 %v1001_v42 }
 0x61f   :  { %v1298_v43 = vpop.eup %1297 }
 0x620   :  { %v1003_v44 = vadd.f32 2.0, %v1298_v43 }
 0x621   :  { %v1300_v45 = vpop.eup %1299 }
 0x622   :  { %v1005_v46 = vmul.f32 %v1298_v43, %v1003_v44  ;;  %v1004_v47 = vadd.f32 2.0, %v1300_v45 }
 0x624   :  { %v1009_v50 = vadd.f32 2.0, %v1005_v46  ;;  %v1006_v51 = vmul.f32 %v1300_v45, %v1004_v47  ;;  %v1007_v52 = vmul.f32 %v1005_v46, %v995_v34 }
 0x626   :  { %1301 = vrcp.f32 %v1009_v50  ;;  %v1010_v1 = vadd.f32 2.0, %v1006_v51  ;;  %v1008_v55 = vmul.f32 %v1006_v51, %v996_v38 }
 0x628   :  { %1303 = vrcp.f32 %v1010_v1 }
 0x633   :  { %v1302_v54 = vpop.eup %1301 }
 0x634   :  { %v1013_v56 = vmul.f32 %v1302_v54, %v1007_v52 }
 0x635   :  { %v1304_v58 = vpop.eup %1303 }
 0x636   :  { %v1014_v59 = vmul.f32 %v1304_v58, %v1008_v55  ;;  %v1027_v60 = vmul.f32 %v1020_v53, %v1013_v56 }
 0x638   :  { %v1028_v61 = vmul.f32 %v1024_v57, %v1014_v59  ;;  %v1029_v62 = vsel %vm194_vm3, %v1027_v60, 0.0 }
 0x63a   :  { %v1030_v10 = vsel %vm194_vm3, %v1028_v61, 0.0 }
 0x63b   :  { %v1031_v63 = vadd.f32 %v1030_v10, %v1029_v62 }
 0x63d   :  { %1032 = vadd.xlane.f32.xlu0 %v1031_v63 }
 0x6c6   :  { %v1033_v8 = vpop.xlane.xlu0 %1032 }
 0x6c7   :  { %v1041_v2 = vadd.f32 %v1126_v0, %v1033_v8 }
 0x6c9   :  { %1043 = vst.msk [vmem:[%s1630_s12] sm:$0x3] %vm1042_vm4, %v1041_v2 }
 0x6ca   :  { %1048 = vsyncpa [#allocation5], 1 }
 0x6cb   :  { %1049 = vsyncpa [#allocation7], 1 }
 0x6cc   :  { %1050 = vsyncpa [#allocation10], 1 }
 0x6cd   :  { %1051 = vsyncpa [#allocation13], 1 }

</bundles_post_ra>
